<compile_context>
chip_gen: v5e
topology: v5e:2x2
jax: 0.10.0
libtpu: 0.0.40
codegen_flags: <defaults>
</compile_context>

<pallas_src>
import jax
import jax.numpy as jnp
from jax import lax
from jax.experimental import pallas as pl
from jax.experimental.pallas import tpu as pltpu


HIDDEN = 32  # hidden_size of the LSTM


def _lstm_fc_kernel(x_ref, w_hh_ref, w_ih_ref, bias_ref, w_fc_ref, b_fc_ref, out_ref):
    """x_ref:    (T, B, 1)   raw input, time-major
       w_hh_ref: (H, 4H)     W_hh^T (PyTorch gate order i, f, g, o along 4H)
       w_ih_ref: (1, 4H)     W_ih row (input_size == 1)
       bias_ref: (1, 4H)     b_ih + b_hh
       w_fc_ref: (1, H)      fc.weight
       b_fc_ref: (1, 1)      fc.bias (SMEM scalar)
       out_ref:  (B, 1)"""
    T, B, _ = x_ref.shape
    H = w_hh_ref.shape[0]

    w_hh = w_hh_ref[...]          # loop-invariant; hoisted out of the loop
    w_ih = w_ih_ref[...]
    bias = bias_ref[...]

    def step(t, carry):
        h, c = carry
        x_t = x_ref[t]                                              # (B, 1)
        gates = (x_t * w_ih + bias
                 + jnp.dot(h, w_hh, preferred_element_type=jnp.float32))  # (B, 4H)
        # Full-vreg nonlinearities (4H == 128 lanes), then cheap lane slices.
        s = jax.nn.sigmoid(gates)
        tg = jnp.tanh(gates)
        i = s[:, 0 * H:1 * H]
        f = s[:, 1 * H:2 * H]
        o = s[:, 3 * H:4 * H]
        g = tg[:, 2 * H:3 * H]
        c_new = f * c + i * g
        h_new = o * jnp.tanh(c_new)
        return (h_new, c_new)

    h0 = jnp.zeros((B, H), jnp.float32)
    c0 = jnp.zeros((B, H), jnp.float32)
    # Fully unroll for small T (LLO scheduling visibility); partial unroll otherwise.
    h, _ = lax.fori_loop(0, T, step, (h0, c0),
                         unroll=True if T <= 64 else 8)

    # Final Linear(H, 1): VPU multiply + lane reduction (no N=1 MXU matmul).
    out_ref[...] = jnp.sum(h * w_fc_ref[...], axis=-1, keepdims=True) + b_fc_ref[0, 0]


def price_predictor(x, params):
    """x: (B, T, 1) float32, batch_first like the PyTorch module. Returns (B, 1)."""
    w_ih, w_hh, b_ih, b_hh, w_fc, b_fc = params
    B, T, _ = x.shape
    H = HIDDEN

    # Cheap layout glue only (no O(T*B*4H) materialization).
    x_tm = jnp.swapaxes(x, 0, 1).astype(jnp.float32)                    # (T, B, 1)
    w_ih_row = jnp.asarray(w_ih[:, 0], jnp.float32).reshape(1, 4 * H)   # (1, 4H)
    bias = jnp.asarray(b_ih + b_hh, jnp.float32).reshape(1, 4 * H)      # (1, 4H)
    w_hh_t = jnp.asarray(w_hh.T, jnp.float32)                           # (H, 4H)
    w_fc_row = jnp.asarray(w_fc, jnp.float32).reshape(1, H)             # (1, H)
    b_fc_a = jnp.asarray(b_fc, jnp.float32).reshape(1, 1)               # (1, 1)

    return pl.pallas_call(
        _lstm_fc_kernel,
        out_shape=jax.ShapeDtypeStruct((B, 1), jnp.float32),
        in_specs=[
            pl.BlockSpec(memory_space=pltpu.MemorySpace.VMEM),   # x (T, B, 1)
            pl.BlockSpec(memory_space=pltpu.MemorySpace.VMEM),   # W_hh^T
            pl.BlockSpec(memory_space=pltpu.MemorySpace.VMEM),   # W_ih row
            pl.BlockSpec(memory_space=pltpu.MemorySpace.VMEM),   # combined bias
            pl.BlockSpec(memory_space=pltpu.MemorySpace.VMEM),   # fc.weight
            pl.BlockSpec(memory_space=pltpu.MemorySpace.SMEM),   # fc.bias scalar
        ],
        out_specs=pl.BlockSpec(memory_space=pltpu.MemorySpace.VMEM),
        compiler_params=pltpu.CompilerParams(vmem_limit_bytes=16 * 1024 * 1024),
    )(x_tm, w_hh_t, w_ih_row, bias, w_fc_row, b_fc_a)


def reference(x, params):
    """Pure-JAX re-implementation of the PyTorch forward (for verification)."""
    w_ih, w_hh, b_ih, b_hh, w_fc, b_fc = params
    B = x.shape[0]
    H = HIDDEN

    def step(carry, x_t):
        h, c = carry
        gates = x_t @ w_ih.T + b_ih + h @ w_hh.T + b_hh
        i, f, g, o = jnp.split(gates, 4, axis=-1)
        i, f, g, o = jax.nn.sigmoid(i), jax.nn.sigmoid(f), jnp.tanh(g), jax.nn.sigmoid(o)
        c = f * c + i * g
        h = o * jnp.tanh(c)
        return (h, c), None

    init = (jnp.zeros((B, H), jnp.float32), jnp.zeros((B, H), jnp.float32))
    (h, _), _ = lax.scan(step, init, jnp.swapaxes(x, 0, 1))
    return h @ w_fc.T + b_fc


def init_params(key, hidden_size=HIDDEN):
    """Deterministic synthetic params; same shapes / uniform(-1/sqrt(H), 1/sqrt(H))
    init convention as torch.nn.LSTM / nn.Linear."""
    H = hidden_size
    k = 1.0 / jnp.sqrt(jnp.float32(H))
    keys = jax.random.split(key, 6)
    u = lambda kk, shape: jax.random.uniform(kk, shape, jnp.float32, -k, k)
    w_ih = u(keys[0], (4 * H, 1))     # lstm.weight_ih_l0
    w_hh = u(keys[1], (4 * H, H))     # lstm.weight_hh_l0
    b_ih = u(keys[2], (4 * H,))       # lstm.bias_ih_l0
    b_hh = u(keys[3], (4 * H,))       # lstm.bias_hh_l0
    w_fc = u(keys[4], (1, H))         # fc.weight
    b_fc = u(keys[5], (1,))           # fc.bias
    return (w_ih, w_hh, b_ih, b_hh, w_fc, b_fc)


if __name__ == "__main__":
    key = jax.random.PRNGKey(0)
    k_param, k_x = jax.random.split(key)

    params = init_params(k_param)
    B, T = 2, 8
    x = jax.random.normal(k_x, (B, T, 1), jnp.float32)

    out = jax.block_until_ready(price_predictor(x, params))
    ref = jax.block_until_ready(reference(x, params))

    assert out.shape == (B, 1), out.shape
    assert jnp.allclose(out, ref, atol=1e-5, rtol=1e-5), (out, ref)
    print("KERNEL_OK")
</pallas_src>

<mosaic_0001>
module attributes {stable_mosaic.version = 11 : i64} {
  func.func @_lstm_fc_kernel(%arg0: memref<8x2x1xf32, #tpu.memory_space<vmem>>, %arg1: memref<32x128xf32, #tpu.memory_space<vmem>>, %arg2: memref<1x128xf32, #tpu.memory_space<vmem>>, %arg3: memref<1x128xf32, #tpu.memory_space<vmem>>, %arg4: memref<1x32xf32, #tpu.memory_space<vmem>>, %arg5: memref<1x1xf32, #tpu.memory_space<smem>>, %arg6: memref<2x1xf32, #tpu.memory_space<vmem>>) attributes {dimension_semantics = [], scalar_prefetch = 0 : i64, scratch_operands = 0 : i64, tpu.core_type = #tpu.core_type<tc>} {
    %c0 = arith.constant 0 : index
    %c0_0 = arith.constant 0 : index
    %0 = vector.load %arg1[%c0, %c0_0] : memref<32x128xf32, #tpu.memory_space<vmem>>, vector<32x128xf32>
    %c0_1 = arith.constant 0 : index
    %c0_2 = arith.constant 0 : index
    %1 = vector.load %arg2[%c0_1, %c0_2] : memref<1x128xf32, #tpu.memory_space<vmem>>, vector<1x128xf32>
    %c0_3 = arith.constant 0 : index
    %c0_4 = arith.constant 0 : index
    %2 = vector.load %arg3[%c0_3, %c0_4] : memref<1x128xf32, #tpu.memory_space<vmem>>, vector<1x128xf32>
    %cst = arith.constant 0.000000e+00 : f32
    %3 = vector.broadcast %cst : f32 to vector<2x32xf32>
    %cst_5 = arith.constant 0.000000e+00 : f32
    %4 = vector.broadcast %cst_5 : f32 to vector<2x32xf32>
    %c0_i32 = arith.constant 0 : i32
    %5 = arith.index_cast %c0_i32 : i32 to index
    %c0_6 = arith.constant 0 : index
    %c0_7 = arith.constant 0 : index
    %6 = vector.load %arg0[%5, %c0_6, %c0_7] : memref<8x2x1xf32, #tpu.memory_space<vmem>>, vector<1x2x1xf32>
    %7 = vector.shape_cast %6 : vector<1x2x1xf32> to vector<2x1xf32>
    %8 = vector.broadcast %7 : vector<2x1xf32> to vector<2x128xf32>
    %9 = vector.broadcast %1 : vector<1x128xf32> to vector<2x128xf32>
    %10 = arith.mulf %8, %9 : vector<2x128xf32>
    %11 = vector.broadcast %2 : vector<1x128xf32> to vector<2x128xf32>
    %12 = arith.addf %10, %11 : vector<2x128xf32>
    %cst_8 = arith.constant dense<0.000000e+00> : vector<2x128xf32>
    %13 = tpu.matmul %3, %0, %cst_8 {dimension_numbers = #tpu.dot_dimension_numbers<[1], [0], [0], [1], [0, 0, 1, 1], [], []>} : vector<2x32xf32>, vector<32x128xf32>, vector<2x128xf32> -> vector<2x128xf32>
    %14 = arith.addf %12, %13 : vector<2x128xf32>
    %15 = arith.negf %14 : vector<2x128xf32>
    %16 = math.exp %15 : vector<2x128xf32>
    %cst_9 = arith.constant 1.000000e+00 : f32
    %17 = vector.broadcast %cst_9 : f32 to vector<2x128xf32>
    %18 = arith.addf %17, %16 : vector<2x128xf32>
    %19 = arith.divf %17, %18 : vector<2x128xf32>
    %20 = math.tanh %14 : vector<2x128xf32>
    %21 = vector.extract_strided_slice %19 {offsets = [0, 0], sizes = [2, 32], strides = [1, 1]} : vector<2x128xf32> to vector<2x32xf32>
    %22 = vector.extract_strided_slice %19 {offsets = [0, 32], sizes = [2, 32], strides = [1, 1]} : vector<2x128xf32> to vector<2x32xf32>
    %23 = vector.extract_strided_slice %19 {offsets = [0, 96], sizes = [2, 32], strides = [1, 1]} : vector<2x128xf32> to vector<2x32xf32>
    %24 = vector.extract_strided_slice %20 {offsets = [0, 64], sizes = [2, 32], strides = [1, 1]} : vector<2x128xf32> to vector<2x32xf32>
    %25 = arith.mulf %22, %4 : vector<2x32xf32>
    %26 = arith.mulf %21, %24 : vector<2x32xf32>
    %27 = arith.addf %25, %26 : vector<2x32xf32>
    %28 = math.tanh %27 : vector<2x32xf32>
    %29 = arith.mulf %23, %28 : vector<2x32xf32>
    %c1_i32 = arith.constant 1 : i32
    %30 = arith.index_cast %c1_i32 : i32 to index
    %c0_10 = arith.constant 0 : index
    %c0_11 = arith.constant 0 : index
    %31 = vector.load %arg0[%30, %c0_10, %c0_11] : memref<8x2x1xf32, #tpu.memory_space<vmem>>, vector<1x2x1xf32>
    %32 = vector.shape_cast %31 : vector<1x2x1xf32> to vector<2x1xf32>
    %33 = vector.broadcast %32 : vector<2x1xf32> to vector<2x128xf32>
    %34 = vector.broadcast %1 : vector<1x128xf32> to vector<2x128xf32>
    %35 = arith.mulf %33, %34 : vector<2x128xf32>
    %36 = vector.broadcast %2 : vector<1x128xf32> to vector<2x128xf32>
    %37 = arith.addf %35, %36 : vector<2x128xf32>
    %cst_12 = arith.constant dense<0.000000e+00> : vector<2x128xf32>
    %38 = tpu.matmul %29, %0, %cst_12 {dimension_numbers = #tpu.dot_dimension_numbers<[1], [0], [0], [1], [0, 0, 1, 1], [], []>} : vector<2x32xf32>, vector<32x128xf32>, vector<2x128xf32> -> vector<2x128xf32>
    %39 = arith.addf %37, %38 : vector<2x128xf32>
    %40 = arith.negf %39 : vector<2x128xf32>
    %41 = math.exp %40 : vector<2x128xf32>
    %cst_13 = arith.constant 1.000000e+00 : f32
    %42 = vector.broadcast %cst_13 : f32 to vector<2x128xf32>
    %43 = arith.addf %42, %41 : vector<2x128xf32>
    %44 = arith.divf %42, %43 : vector<2x128xf32>
    %45 = math.tanh %39 : vector<2x128xf32>
    %46 = vector.extract_strided_slice %44 {offsets = [0, 0], sizes = [2, 32], strides = [1, 1]} : vector<2x128xf32> to vector<2x32xf32>
    %47 = vector.extract_strided_slice %44 {offsets = [0, 32], sizes = [2, 32], strides = [1, 1]} : vector<2x128xf32> to vector<2x32xf32>
    %48 = vector.extract_strided_slice %44 {offsets = [0, 96], sizes = [2, 32], strides = [1, 1]} : vector<2x128xf32> to vector<2x32xf32>
    %49 = vector.extract_strided_slice %45 {offsets = [0, 64], sizes = [2, 32], strides = [1, 1]} : vector<2x128xf32> to vector<2x32xf32>
    %50 = arith.mulf %47, %27 : vector<2x32xf32>
    %51 = arith.mulf %46, %49 : vector<2x32xf32>
    %52 = arith.addf %50, %51 : vector<2x32xf32>
    %53 = math.tanh %52 : vector<2x32xf32>
    %54 = arith.mulf %48, %53 : vector<2x32xf32>
    %c2_i32 = arith.constant 2 : i32
    %55 = arith.index_cast %c2_i32 : i32 to index
    %c0_14 = arith.constant 0 : index
    %c0_15 = arith.constant 0 : index
    %56 = vector.load %arg0[%55, %c0_14, %c0_15] : memref<8x2x1xf32, #tpu.memory_space<vmem>>, vector<1x2x1xf32>
    %57 = vector.shape_cast %56 : vector<1x2x1xf32> to vector<2x1xf32>
    %58 = vector.broadcast %57 : vector<2x1xf32> to vector<2x128xf32>
    %59 = vector.broadcast %1 : vector<1x128xf32> to vector<2x128xf32>
    %60 = arith.mulf %58, %59 : vector<2x128xf32>
    %61 = vector.broadcast %2 : vector<1x128xf32> to vector<2x128xf32>
    %62 = arith.addf %60, %61 : vector<2x128xf32>
    %cst_16 = arith.constant dense<0.000000e+00> : vector<2x128xf32>
    %63 = tpu.matmul %54, %0, %cst_16 {dimension_numbers = #tpu.dot_dimension_numbers<[1], [0], [0], [1], [0, 0, 1, 1], [], []>} : vector<2x32xf32>, vector<32x128xf32>, vector<2x128xf32> -> vector<2x128xf32>
    %64 = arith.addf %62, %63 : vector<2x128xf32>
    %65 = arith.negf %64 : vector<2x128xf32>
    %66 = math.exp %65 : vector<2x128xf32>
    %cst_17 = arith.constant 1.000000e+00 : f32
    %67 = vector.broadcast %cst_17 : f32 to vector<2x128xf32>
    %68 = arith.addf %67, %66 : vector<2x128xf32>
    %69 = arith.divf %67, %68 : vector<2x128xf32>
    %70 = math.tanh %64 : vector<2x128xf32>
    %71 = vector.extract_strided_slice %69 {offsets = [0, 0], sizes = [2, 32], strides = [1, 1]} : vector<2x128xf32> to vector<2x32xf32>
    %72 = vector.extract_strided_slice %69 {offsets = [0, 32], sizes = [2, 32], strides = [1, 1]} : vector<2x128xf32> to vector<2x32xf32>
    %73 = vector.extract_strided_slice %69 {offsets = [0, 96], sizes = [2, 32], strides = [1, 1]} : vector<2x128xf32> to vector<2x32xf32>
    %74 = vector.extract_strided_slice %70 {offsets = [0, 64], sizes = [2, 32], strides = [1, 1]} : vector<2x128xf32> to vector<2x32xf32>
    %75 = arith.mulf %72, %52 : vector<2x32xf32>
    %76 = arith.mulf %71, %74 : vector<2x32xf32>
    %77 = arith.addf %75, %76 : vector<2x32xf32>
    %78 = math.tanh %77 : vector<2x32xf32>
    %79 = arith.mulf %73, %78 : vector<2x32xf32>
    %c3_i32 = arith.constant 3 : i32
    %80 = arith.index_cast %c3_i32 : i32 to index
    %c0_18 = arith.constant 0 : index
    %c0_19 = arith.constant 0 : index
    %81 = vector.load %arg0[%80, %c0_18, %c0_19] : memref<8x2x1xf32, #tpu.memory_space<vmem>>, vector<1x2x1xf32>
    %82 = vector.shape_cast %81 : vector<1x2x1xf32> to vector<2x1xf32>
    %83 = vector.broadcast %82 : vector<2x1xf32> to vector<2x128xf32>
    %84 = vector.broadcast %1 : vector<1x128xf32> to vector<2x128xf32>
    %85 = arith.mulf %83, %84 : vector<2x128xf32>
    %86 = vector.broadcast %2 : vector<1x128xf32> to vector<2x128xf32>
    %87 = arith.addf %85, %86 : vector<2x128xf32>
    %cst_20 = arith.constant dense<0.000000e+00> : vector<2x128xf32>
    %88 = tpu.matmul %79, %0, %cst_20 {dimension_numbers = #tpu.dot_dimension_numbers<[1], [0], [0], [1], [0, 0, 1, 1], [], []>} : vector<2x32xf32>, vector<32x128xf32>, vector<2x128xf32> -> vector<2x128xf32>
    %89 = arith.addf %87, %88 : vector<2x128xf32>
    %90 = arith.negf %89 : vector<2x128xf32>
    %91 = math.exp %90 : vector<2x128xf32>
    %cst_21 = arith.constant 1.000000e+00 : f32
    %92 = vector.broadcast %cst_21 : f32 to vector<2x128xf32>
    %93 = arith.addf %92, %91 : vector<2x128xf32>
    %94 = arith.divf %92, %93 : vector<2x128xf32>
    %95 = math.tanh %89 : vector<2x128xf32>
    %96 = vector.extract_strided_slice %94 {offsets = [0, 0], sizes = [2, 32], strides = [1, 1]} : vector<2x128xf32> to vector<2x32xf32>
    %97 = vector.extract_strided_slice %94 {offsets = [0, 32], sizes = [2, 32], strides = [1, 1]} : vector<2x128xf32> to vector<2x32xf32>
    %98 = vector.extract_strided_slice %94 {offsets = [0, 96], sizes = [2, 32], strides = [1, 1]} : vector<2x128xf32> to vector<2x32xf32>
    %99 = vector.extract_strided_slice %95 {offsets = [0, 64], sizes = [2, 32], strides = [1, 1]} : vector<2x128xf32> to vector<2x32xf32>
    %100 = arith.mulf %97, %77 : vector<2x32xf32>
    %101 = arith.mulf %96, %99 : vector<2x32xf32>
    %102 = arith.addf %100, %101 : vector<2x32xf32>
    %103 = math.tanh %102 : vector<2x32xf32>
    %104 = arith.mulf %98, %103 : vector<2x32xf32>
    %c4_i32 = arith.constant 4 : i32
    %105 = arith.index_cast %c4_i32 : i32 to index
    %c0_22 = arith.constant 0 : index
    %c0_23 = arith.constant 0 : index
    %106 = vector.load %arg0[%105, %c0_22, %c0_23] : memref<8x2x1xf32, #tpu.memory_space<vmem>>, vector<1x2x1xf32>
    %107 = vector.shape_cast %106 : vector<1x2x1xf32> to vector<2x1xf32>
    %108 = vector.broadcast %107 : vector<2x1xf32> to vector<2x128xf32>
    %109 = vector.broadcast %1 : vector<1x128xf32> to vector<2x128xf32>
    %110 = arith.mulf %108, %109 : vector<2x128xf32>
    %111 = vector.broadcast %2 : vector<1x128xf32> to vector<2x128xf32>
    %112 = arith.addf %110, %111 : vector<2x128xf32>
    %cst_24 = arith.constant dense<0.000000e+00> : vector<2x128xf32>
    %113 = tpu.matmul %104, %0, %cst_24 {dimension_numbers = #tpu.dot_dimension_numbers<[1], [0], [0], [1], [0, 0, 1, 1], [], []>} : vector<2x32xf32>, vector<32x128xf32>, vector<2x128xf32> -> vector<2x128xf32>
    %114 = arith.addf %112, %113 : vector<2x128xf32>
    %115 = arith.negf %114 : vector<2x128xf32>
    %116 = math.exp %115 : vector<2x128xf32>
    %cst_25 = arith.constant 1.000000e+00 : f32
    %117 = vector.broadcast %cst_25 : f32 to vector<2x128xf32>
    %118 = arith.addf %117, %116 : vector<2x128xf32>
    %119 = arith.divf %117, %118 : vector<2x128xf32>
    %120 = math.tanh %114 : vector<2x128xf32>
    %121 = vector.extract_strided_slice %119 {offsets = [0, 0], sizes = [2, 32], strides = [1, 1]} : vector<2x128xf32> to vector<2x32xf32>
    %122 = vector.extract_strided_slice %119 {offsets = [0, 32], sizes = [2, 32], strides = [1, 1]} : vector<2x128xf32> to vector<2x32xf32>
    %123 = vector.extract_strided_slice %119 {offsets = [0, 96], sizes = [2, 32], strides = [1, 1]} : vector<2x128xf32> to vector<2x32xf32>
    %124 = vector.extract_strided_slice %120 {offsets = [0, 64], sizes = [2, 32], strides = [1, 1]} : vector<2x128xf32> to vector<2x32xf32>
    %125 = arith.mulf %122, %102 : vector<2x32xf32>
    %126 = arith.mulf %121, %124 : vector<2x32xf32>
    %127 = arith.addf %125, %126 : vector<2x32xf32>
    %128 = math.tanh %127 : vector<2x32xf32>
    %129 = arith.mulf %123, %128 : vector<2x32xf32>
    %c5_i32 = arith.constant 5 : i32
    %130 = arith.index_cast %c5_i32 : i32 to index
    %c0_26 = arith.constant 0 : index
    %c0_27 = arith.constant 0 : index
    %131 = vector.load %arg0[%130, %c0_26, %c0_27] : memref<8x2x1xf32, #tpu.memory_space<vmem>>, vector<1x2x1xf32>
    %132 = vector.shape_cast %131 : vector<1x2x1xf32> to vector<2x1xf32>
    %133 = vector.broadcast %132 : vector<2x1xf32> to vector<2x128xf32>
    %134 = vector.broadcast %1 : vector<1x128xf32> to vector<2x128xf32>
    %135 = arith.mulf %133, %134 : vector<2x128xf32>
    %136 = vector.broadcast %2 : vector<1x128xf32> to vector<2x128xf32>
    %137 = arith.addf %135, %136 : vector<2x128xf32>
    %cst_28 = arith.constant dense<0.000000e+00> : vector<2x128xf32>
    %138 = tpu.matmul %129, %0, %cst_28 {dimension_numbers = #tpu.dot_dimension_numbers<[1], [0], [0], [1], [0, 0, 1, 1], [], []>} : vector<2x32xf32>, vector<32x128xf32>, vector<2x128xf32> -> vector<2x128xf32>
    %139 = arith.addf %137, %138 : vector<2x128xf32>
    %140 = arith.negf %139 : vector<2x128xf32>
    %141 = math.exp %140 : vector<2x128xf32>
    %cst_29 = arith.constant 1.000000e+00 : f32
    %142 = vector.broadcast %cst_29 : f32 to vector<2x128xf32>
    %143 = arith.addf %142, %141 : vector<2x128xf32>
    %144 = arith.divf %142, %143 : vector<2x128xf32>
    %145 = math.tanh %139 : vector<2x128xf32>
    %146 = vector.extract_strided_slice %144 {offsets = [0, 0], sizes = [2, 32], strides = [1, 1]} : vector<2x128xf32> to vector<2x32xf32>
    %147 = vector.extract_strided_slice %144 {offsets = [0, 32], sizes = [2, 32], strides = [1, 1]} : vector<2x128xf32> to vector<2x32xf32>
    %148 = vector.extract_strided_slice %144 {offsets = [0, 96], sizes = [2, 32], strides = [1, 1]} : vector<2x128xf32> to vector<2x32xf32>
    %149 = vector.extract_strided_slice %145 {offsets = [0, 64], sizes = [2, 32], strides = [1, 1]} : vector<2x128xf32> to vector<2x32xf32>
    %150 = arith.mulf %147, %127 : vector<2x32xf32>
    %151 = arith.mulf %146, %149 : vector<2x32xf32>
    %152 = arith.addf %150, %151 : vector<2x32xf32>
    %153 = math.tanh %152 : vector<2x32xf32>
    %154 = arith.mulf %148, %153 : vector<2x32xf32>
    %c6_i32 = arith.constant 6 : i32
    %155 = arith.index_cast %c6_i32 : i32 to index
    %c0_30 = arith.constant 0 : index
    %c0_31 = arith.constant 0 : index
    %156 = vector.load %arg0[%155, %c0_30, %c0_31] : memref<8x2x1xf32, #tpu.memory_space<vmem>>, vector<1x2x1xf32>
    %157 = vector.shape_cast %156 : vector<1x2x1xf32> to vector<2x1xf32>
    %158 = vector.broadcast %157 : vector<2x1xf32> to vector<2x128xf32>
    %159 = vector.broadcast %1 : vector<1x128xf32> to vector<2x128xf32>
    %160 = arith.mulf %158, %159 : vector<2x128xf32>
    %161 = vector.broadcast %2 : vector<1x128xf32> to vector<2x128xf32>
    %162 = arith.addf %160, %161 : vector<2x128xf32>
    %cst_32 = arith.constant dense<0.000000e+00> : vector<2x128xf32>
    %163 = tpu.matmul %154, %0, %cst_32 {dimension_numbers = #tpu.dot_dimension_numbers<[1], [0], [0], [1], [0, 0, 1, 1], [], []>} : vector<2x32xf32>, vector<32x128xf32>, vector<2x128xf32> -> vector<2x128xf32>
    %164 = arith.addf %162, %163 : vector<2x128xf32>
    %165 = arith.negf %164 : vector<2x128xf32>
    %166 = math.exp %165 : vector<2x128xf32>
    %cst_33 = arith.constant 1.000000e+00 : f32
    %167 = vector.broadcast %cst_33 : f32 to vector<2x128xf32>
    %168 = arith.addf %167, %166 : vector<2x128xf32>
    %169 = arith.divf %167, %168 : vector<2x128xf32>
    %170 = math.tanh %164 : vector<2x128xf32>
    %171 = vector.extract_strided_slice %169 {offsets = [0, 0], sizes = [2, 32], strides = [1, 1]} : vector<2x128xf32> to vector<2x32xf32>
    %172 = vector.extract_strided_slice %169 {offsets = [0, 32], sizes = [2, 32], strides = [1, 1]} : vector<2x128xf32> to vector<2x32xf32>
    %173 = vector.extract_strided_slice %169 {offsets = [0, 96], sizes = [2, 32], strides = [1, 1]} : vector<2x128xf32> to vector<2x32xf32>
    %174 = vector.extract_strided_slice %170 {offsets = [0, 64], sizes = [2, 32], strides = [1, 1]} : vector<2x128xf32> to vector<2x32xf32>
    %175 = arith.mulf %172, %152 : vector<2x32xf32>
    %176 = arith.mulf %171, %174 : vector<2x32xf32>
    %177 = arith.addf %175, %176 : vector<2x32xf32>
    %178 = math.tanh %177 : vector<2x32xf32>
    %179 = arith.mulf %173, %178 : vector<2x32xf32>
    %c7_i32 = arith.constant 7 : i32
    %180 = arith.index_cast %c7_i32 : i32 to index
    %c0_34 = arith.constant 0 : index
    %c0_35 = arith.constant 0 : index
    %181 = vector.load %arg0[%180, %c0_34, %c0_35] : memref<8x2x1xf32, #tpu.memory_space<vmem>>, vector<1x2x1xf32>
    %182 = vector.shape_cast %181 : vector<1x2x1xf32> to vector<2x1xf32>
    %183 = vector.broadcast %182 : vector<2x1xf32> to vector<2x128xf32>
    %184 = vector.broadcast %1 : vector<1x128xf32> to vector<2x128xf32>
    %185 = arith.mulf %183, %184 : vector<2x128xf32>
    %186 = vector.broadcast %2 : vector<1x128xf32> to vector<2x128xf32>
    %187 = arith.addf %185, %186 : vector<2x128xf32>
    %cst_36 = arith.constant dense<0.000000e+00> : vector<2x128xf32>
    %188 = tpu.matmul %179, %0, %cst_36 {dimension_numbers = #tpu.dot_dimension_numbers<[1], [0], [0], [1], [0, 0, 1, 1], [], []>} : vector<2x32xf32>, vector<32x128xf32>, vector<2x128xf32> -> vector<2x128xf32>
    %189 = arith.addf %187, %188 : vector<2x128xf32>
    %190 = arith.negf %189 : vector<2x128xf32>
    %191 = math.exp %190 : vector<2x128xf32>
    %cst_37 = arith.constant 1.000000e+00 : f32
    %192 = vector.broadcast %cst_37 : f32 to vector<2x128xf32>
    %193 = arith.addf %192, %191 : vector<2x128xf32>
    %194 = arith.divf %192, %193 : vector<2x128xf32>
    %195 = math.tanh %189 : vector<2x128xf32>
    %196 = vector.extract_strided_slice %194 {offsets = [0, 0], sizes = [2, 32], strides = [1, 1]} : vector<2x128xf32> to vector<2x32xf32>
    %197 = vector.extract_strided_slice %194 {offsets = [0, 32], sizes = [2, 32], strides = [1, 1]} : vector<2x128xf32> to vector<2x32xf32>
    %198 = vector.extract_strided_slice %194 {offsets = [0, 96], sizes = [2, 32], strides = [1, 1]} : vector<2x128xf32> to vector<2x32xf32>
    %199 = vector.extract_strided_slice %195 {offsets = [0, 64], sizes = [2, 32], strides = [1, 1]} : vector<2x128xf32> to vector<2x32xf32>
    %200 = arith.mulf %197, %177 : vector<2x32xf32>
    %201 = arith.mulf %196, %199 : vector<2x32xf32>
    %202 = arith.addf %200, %201 : vector<2x32xf32>
    %203 = math.tanh %202 : vector<2x32xf32>
    %204 = arith.mulf %198, %203 : vector<2x32xf32>
    %c8_i32 = arith.constant 8 : i32
    %c0_38 = arith.constant 0 : index
    %c0_39 = arith.constant 0 : index
    %205 = vector.load %arg4[%c0_38, %c0_39] : memref<1x32xf32, #tpu.memory_space<vmem>>, vector<1x32xf32>
    %206 = vector.broadcast %205 : vector<1x32xf32> to vector<2x32xf32>
    %207 = arith.mulf %204, %206 : vector<2x32xf32>
    %cst_40 = arith.constant dense<0.000000e+00> : vector<2xf32>
    %208 = vector.multi_reduction <add>, %207, %cst_40 [1] : vector<2x32xf32> to vector<2xf32>
    %209 = vector.shape_cast %208 : vector<2xf32> to vector<2x1xf32>
    %c0_41 = arith.constant 0 : index
    %c0_42 = arith.constant 0 : index
    %210 = memref.load %arg5[%c0_41, %c0_42] : memref<1x1xf32, #tpu.memory_space<smem>>
    %211 = vector.broadcast %210 : f32 to vector<2x1xf32>
    %212 = arith.addf %209, %211 : vector<2x1xf32>
    %c0_43 = arith.constant 0 : index
    %c0_44 = arith.constant 0 : index
    %213 = vector.load %arg6[%c0_43, %c0_44] : memref<2x1xf32, #tpu.memory_space<vmem>>, vector<2x1xf32>
    tpu.vector_store %arg6[%c0_43, %c0_44], %212 {strides = array<i32>} : memref<2x1xf32, #tpu.memory_space<vmem>>, vector<2x1xf32>,
    return
  }
}

</mosaic_0001>

<bundles_post_ra>
// kernel: tpu_custom_call.1
= control target key start
LH: loop header
LB: loop body
LE: loop exit
PB: predicated region body
PF: predicated region fallthrough
CT: control target
= control target key end

     0   :  { %12 = vsyncpa [#allocation4], 0  ;;  %s777_s24 = smov [#allocation3]   ;;  %s778_s26 = smov 128   ;;  %s921_s0 = inlined_call_operand.vmem [shape: f32[8,2,1], index: 0, kind: input, shape index: {}]   ;;  %s922_s1 = inlined_call_operand.hbm [shape: f32[32,128], index: 1, kind: input, shape index: {}]   ;;  %s923_s2 = inlined_call_operand.vmem [shape: f32[1,128], index: 2, kind: input, shape index: {}]   ;;  %s924_s3 = inlined_call_operand.vmem [shape: f32[1,128], index: 3, kind: input, shape index: {}]   ;;  %s925_s4 = inlined_call_operand.vmem [shape: f32[1,32], index: 4, kind: input, shape index: {}]   ;;  %s926_s5 = inlined_call_operand.<no memory space> [shape: f32[1,1], index: 5, kind: input, shape index: {}]   ;;  %s927_s6 = inlined_call_operand.vmem [shape: f32[2,1], index: 6, kind: output, shape index: {}]  }
   0x1   :  { %s19_s23 = sshll.u32 %s922_s1, 4  ;;  %s21_s25 = sshll.u32 %s777_s24, 4  ;;  %s20_s23 = int_to_ptr.hbm [resolvable:$true] %s19_s23  ;;  %s22_s25 = int_to_ptr.vmem [resolvable:$true] %s21_s25 }
   0x2   :  { %s779_s27 = smov 8  }
   0x3   :  { %27 = dma.hbm_to_vmem [thread:$0]  %s20_s23, 512, %s22_s25, [#allocation4], %s778_s26, %s778_s26, %s779_s27  }
   0x4   :  { %775 = dma.done.wait [#allocation4], 512  }
   0x5   :  { %776 = vsyncadd [#allocation4], 4294966784  ;;  %v780_v0 = vmov 0   ;;  %v43_v1 = vld [vmem:[#allocation3 + $0x18] sm:$0xff]  ;;  %v42_v2 = vld [vmem:[#allocation3 + $0x10] sm:$0xff]  ;;  %v781_v6 = vmov 0.0  }
   0x6   :  { %681 = vset.pattern.permute.xlu0 %v780_v0  ;;  %682 = vset.pattern.permute.xlu2 %v780_v0  ;;  %v46_v3 = vld [vmem:[%s921_s0] sm:$0x3]  ;;  %v41_v4 = vld [vmem:[#allocation3 + $0x8] sm:$0xff]  ;;  %s782_s9 = smov 64   ;;  %v652_v36 = vld [vmem:[%s921_s0 + $0x2] sm:$0x3] }
   0x7   :  { %683 = vset.pattern.permute.xlu1 %v780_v0  ;;  %76 = vmatpush.msra.mxu0 %v43_v1  ;;  %v40_v5 = vld [vmem:[#allocation3] sm:$0xff]  ;;  %vm60_vm4 = vcmask 261120   ;;  %s784_s24 = smov 96  }
   0x8   :  { %148 = vmatpush.msra.mxu1 %v43_v1  ;;  %49 = vperm.xlu0 %681, %v46_v3   ;;  %v829_v7 = vld [vmem:[%s923_s2] ss:$0 sm:$0xff]  ;;  %s783_s2 = smov 32  }
   0x9   :  { %220 = vmatpush.msra.mxu2 %v43_v1  ;;  %77 = vmatpush.msra.mxu0 %v42_v2  ;;  %v835_v10 = vld [vmem:[%s924_s3] ss:$0 sm:$0xff] }
   0xa   :  { %149 = vmatpush.msra.mxu1 %v42_v2  ;;  %292 = vmatpush.msra.mxu3 %v43_v1 }
   0xb   :  { %221 = vmatpush.msra.mxu2 %v42_v2  ;;  %78 = vmatpush.msra.mxu0 %v41_v4 }
   0xc   :  { %150 = vmatpush.msra.mxu1 %v41_v4  ;;  %293 = vmatpush.msra.mxu3 %v42_v2 }
   0xd   :  { %222 = vmatpush.msra.mxu2 %v41_v4  ;;  %79 = vmatpush.msra.mxu0 %v40_v5 }
   0xe   :  { %151 = vmatpush.msra.mxu1 %v40_v5  ;;  %80 = vmatmul.f32.vlgmr.msra.gmra.mxu0 %v781_v6 }
   0xf   :  { %223 = vmatpush.msra.mxu2 %v40_v5  ;;  %294 = vmatpush.msra.mxu3 %v41_v4 }
  0x10   :  { %364 = vmatpush.msrb.mxu0 %v43_v1  ;;  %436 = vmatpush.msrb.mxu1 %v43_v1 }
  0x11   :  { %508 = vmatpush.msrb.mxu2 %v43_v1  ;;  %295 = vmatpush.msra.mxu3 %v40_v5 }
  0x12   :  { %365 = vmatpush.msrb.mxu0 %v42_v2  ;;  %437 = vmatpush.msrb.mxu1 %v42_v2 }
  0x13   :  { %509 = vmatpush.msrb.mxu2 %v42_v2  ;;  %580 = vmatpush.msrb.mxu3 %v43_v1  ;;  %v655_v1 = vld [vmem:[%s921_s0 + $0x4] sm:$0x3] }
  0x14   :  { %366 = vmatpush.msrb.mxu0 %v41_v4  ;;  %438 = vmatpush.msrb.mxu1 %v41_v4 }
  0x15   :  { %510 = vmatpush.msrb.mxu2 %v41_v4  ;;  %581 = vmatpush.msrb.mxu3 %v42_v2 }
  0x16   :  { %367 = vmatpush.msrb.mxu0 %v40_v5  ;;  %439 = vmatpush.msrb.mxu1 %v40_v5 }
  0x17   :  { %511 = vmatpush.msrb.mxu2 %v40_v5  ;;  %582 = vmatpush.msrb.mxu3 %v41_v4 }
  0x19   :  { %583 = vmatpush.msrb.mxu3 %v40_v5 }
  0x7a   :  { %v50_v8 = vpop.permute.xlu0 %49 }
  0x7b   :  { %v55_v9 = vmul.f32 %v829_v7, %v50_v8 }
  0x7d   :  { %v59_v11 = vadd.f32 %v835_v10, %v55_v9 }
  0x8b   :  { %v81_v12 = vpop.f32.mrf.mxu0 }
  0x8c   :  { %v84_v13 = vadd.f32 %v81_v12, %v59_v11 }
  0x8e   :  { %687 = vtanh.f32 %v84_v13  ;;  %v651_v15 = vmul.f32 -1.442695, %v84_v13 }
  0x90   :  { %689 = vpow2.f32 %v651_v15 }
  0x94   :  { %v688_v14 = vpop.eup %687 }
  0x95   :  { %107 = vrot.lane.b32.xlu0 %v688_v14, %s782_s9 }
  0x96   :  { %v690_v16 = vpop.eup %689 }
  0x97   :  { %v88_v17 = vadd.f32 1.0, %v690_v16 }
  0x99   :  { %691 = vrcp.f32 %v88_v17  ;;  %v100_v23 = vand.u32 2147483648, %v88_v17  ;;  %vm94_vm1 = vweird.f32 %v88_v17  ;;  %v98_v24 = vand.u32 2147483647, %v88_v17 }
  0x9b   :  { %v101_v26 = vor.u32 1.1754944e-38, %v100_v23  ;;  %vm99_vm3 = vcmp.eq.f32.partialorder %v98_v24, 8.507059e+37 }
  0x9f   :  { %v692_v18 = vpop.eup %691 }
  0xa0   :  { %v90_v19 = vmul.f32 %v692_v18, %v88_v17  ;;  %vm95_vm0 = vweird.f32 %v692_v18 }
  0xa1   :  { %vm96_vm2 = vmor %vm94_vm1, %vm95_vm0 }
  0xa2   :  { %v91_v20 = vsub.f32 1.0, %v90_v19 }
  0xa4   :  { %v92_v21 = vmul.f32 %v692_v18, %v91_v20 }
  0xa6   :  { %v93_v22 = vadd.f32 %v692_v18, %v92_v21 }
  0xa8   :  { %v97_v25 = vsel %vm96_vm2, %v692_v18, %v93_v22 }
  0xa9   :  { %v102_v28 = vsel %vm99_vm3, %v101_v26, %v97_v25  ;;  %v658_v26 = vld [vmem:[%s921_s0 + $0x6] sm:$0x3] }
  0xaa   :  { %v105_v30 = vmul.f32 0.0, %v102_v28 }
 0x107   :  { %v108_v27 = vpop.permute.xlu0 %107 }
 0x108   :  { %v110_v29 = vmul.f32 %v108_v27, %v102_v28 }
 0x10a   :  { %112 = vrot.lane.b32.xlu1 %v110_v29, %s783_s2 }
 0x17c   :  { %v113_v31 = vpop.permute.xlu1 %112 }
 0x17d   :  { %v115_v32 = vadd.f32 %v113_v31, %v105_v30 }
 0x17f   :  { %693 = vtanh.f32 %v115_v32 }
 0x185   :  { %v694_v33 = vpop.eup %693 }
 0x186   :  { %118 = vrot.lane.b32.xlu1 %v694_v33, %s782_s9 }
 0x1f8   :  { %v119_v34 = vpop.permute.xlu1 %118 }
 0x1f9   :  { %v121_v35 = vmul.f32 %v119_v34, %v102_v28 }
 0x1fb   :  { %132 = vrot.lane.b32.xlu2 %v121_v35, %s783_s2 }
 0x203   :  { %126 = vperm.xlu2 %682, %v652_v36  }
 0x255   :  { %v133_v37 = vpop.permute.xlu2 %132 }
 0x256   :  { %653 = vmatmul.msk.f32.vlgmr.msra.gmra.mxu1 %vm60_vm4, %v133_v37 }
 0x25d   :  { %v127_v38 = vpop.permute.xlu2 %126 }
 0x25e   :  { %v129_v39 = vmul.f32 %v829_v7, %v127_v38 }
 0x260   :  { %v130_v40 = vadd.f32 %v835_v10, %v129_v39 }
 0x2d3   :  { %v153_v41 = vpop.f32.mrf.mxu1 }
 0x2d4   :  { %v156_v42 = vadd.f32 %v153_v41, %v130_v40 }
 0x2d6   :  { %695 = vtanh.f32 %v156_v42  ;;  %v654_v44 = vmul.f32 -1.442695, %v156_v42 }
 0x2d8   :  { %697 = vpow2.f32 %v654_v44 }
 0x2dc   :  { %v696_v43 = vpop.eup %695 }
 0x2dd   :  { %179 = vrot.lane.b32.xlu0 %v696_v43, %s782_s9 }
 0x2de   :  { %v698_v45 = vpop.eup %697 }
 0x2df   :  { %v160_v46 = vadd.f32 1.0, %v698_v45 }
 0x2e1   :  { %699 = vrcp.f32 %v160_v46  ;;  %v172_v52 = vand.u32 2147483648, %v160_v46  ;;  %vm166_vm6 = vweird.f32 %v160_v46  ;;  %v170_v53 = vand.u32 2147483647, %v160_v46 }
 0x2e3   :  { %v173_v55 = vor.u32 1.1754944e-38, %v172_v52  ;;  %vm171_vm8 = vcmp.eq.f32.partialorder %v170_v53, 8.507059e+37 }
 0x2e7   :  { %v700_v47 = vpop.eup %699 }
 0x2e8   :  { %v162_v48 = vmul.f32 %v700_v47, %v160_v46  ;;  %vm167_vm5 = vweird.f32 %v700_v47 }
 0x2e9   :  { %vm168_vm7 = vmor %vm166_vm6, %vm167_vm5 }
 0x2ea   :  { %v163_v49 = vsub.f32 1.0, %v162_v48 }
 0x2ec   :  { %v164_v50 = vmul.f32 %v700_v47, %v163_v49 }
 0x2ee   :  { %v165_v51 = vadd.f32 %v700_v47, %v164_v50 }
 0x2f0   :  { %v169_v54 = vsel %vm168_vm7, %v700_v47, %v165_v51 }
 0x2f1   :  { %v174_v57 = vsel %vm171_vm8, %v173_v55, %v169_v54  ;;  %v661_v55 = vld [vmem:[%s921_s0 + $0x8] sm:$0x3] }
 0x2f2   :  { %v177_v59 = vmul.f32 %v174_v57, %v115_v32 }
 0x34f   :  { %v180_v56 = vpop.permute.xlu0 %179 }
 0x350   :  { %v182_v58 = vmul.f32 %v180_v56, %v174_v57 }
 0x352   :  { %184 = vrot.lane.b32.xlu1 %v182_v58, %s783_s2 }
 0x35a   :  { %198 = vperm.xlu1 %683, %v655_v1  }
 0x3c4   :  { %v185_v60 = vpop.permute.xlu1 %184 }
 0x3c5   :  { %v187_v61 = vadd.f32 %v185_v60, %v177_v59 }
 0x3c7   :  { %701 = vtanh.f32 %v187_v61 }
 0x3cc   :  { %v199_v3 = vpop.permute.xlu1 %198 }
 0x3cd   :  { %v702_v62 = vpop.eup %701  ;;  %v201_v4 = vmul.f32 %v829_v7, %v199_v3 }
 0x3ce   :  { %190 = vrot.lane.b32.xlu2 %v702_v62, %s782_s9 }
 0x3cf   :  { %v202_v5 = vadd.f32 %v835_v10, %v201_v4 }
 0x428   :  { %v191_v63 = vpop.permute.xlu2 %190 }
 0x429   :  { %v193_v0 = vmul.f32 %v191_v63, %v174_v57 }
 0x42b   :  { %204 = vrot.lane.b32.xlu0 %v193_v0, %s783_s2 }
 0x49d   :  { %v205_v2 = vpop.permute.xlu0 %204 }
 0x49e   :  { %656 = vmatmul.msk.f32.vlgmr.msra.gmra.mxu2 %vm60_vm4, %v205_v2 }
 0x521   :  { %v225_v6 = vpop.f32.mrf.mxu2 }
 0x522   :  { %v228_v8 = vadd.f32 %v225_v6, %v202_v5 }
 0x524   :  { %703 = vtanh.f32 %v228_v8  ;;  %v657_v11 = vmul.f32 -1.442695, %v228_v8 }
 0x526   :  { %705 = vpow2.f32 %v657_v11 }
 0x52a   :  { %v704_v9 = vpop.eup %703 }
 0x52b   :  { %251 = vrot.lane.b32.xlu2 %v704_v9, %s782_s9 }
 0x52c   :  { %v706_v12 = vpop.eup %705 }
 0x52d   :  { %v232_v13 = vadd.f32 1.0, %v706_v12 }
 0x52f   :  { %707 = vrcp.f32 %v232_v13  ;;  %v244_v19 = vand.u32 2147483648, %v232_v13  ;;  %vm238_vm10 = vweird.f32 %v232_v13  ;;  %v242_v20 = vand.u32 2147483647, %v232_v13 }
 0x531   :  { %v245_v22 = vor.u32 1.1754944e-38, %v244_v19  ;;  %vm243_vm12 = vcmp.eq.f32.partialorder %v242_v20, 8.507059e+37 }
 0x535   :  { %v708_v14 = vpop.eup %707 }
 0x536   :  { %v234_v15 = vmul.f32 %v708_v14, %v232_v13  ;;  %vm239_vm9 = vweird.f32 %v708_v14 }
 0x537   :  { %vm240_vm11 = vmor %vm238_vm10, %vm239_vm9 }
 0x538   :  { %v235_v16 = vsub.f32 1.0, %v234_v15 }
 0x53a   :  { %v236_v17 = vmul.f32 %v708_v14, %v235_v16 }
 0x53c   :  { %v237_v18 = vadd.f32 %v708_v14, %v236_v17 }
 0x53e   :  { %v241_v21 = vsel %vm240_vm11, %v708_v14, %v237_v18 }
 0x53f   :  { %v246_v24 = vsel %vm243_vm12, %v245_v22, %v241_v21  ;;  %v664_v22 = vld [vmem:[%s921_s0 + $0xa] sm:$0x3] }
 0x540   :  { %v249_v27 = vmul.f32 %v246_v24, %v187_v61 }
 0x585   :  { %v252_v23 = vpop.permute.xlu2 %251 }
 0x586   :  { %v254_v25 = vmul.f32 %v252_v23, %v246_v24 }
 0x588   :  { %256 = vrot.lane.b32.xlu0 %v254_v25, %s783_s2 }
 0x590   :  { %270 = vperm.xlu0 %681, %v658_v26  }
 0x5fa   :  { %v257_v28 = vpop.permute.xlu0 %256 }
 0x5fb   :  { %v259_v29 = vadd.f32 %v257_v28, %v249_v27 }
 0x5fd   :  { %709 = vtanh.f32 %v259_v29 }
 0x602   :  { %v271_v34 = vpop.permute.xlu0 %270 }
 0x603   :  { %v710_v30 = vpop.eup %709  ;;  %v273_v35 = vmul.f32 %v829_v7, %v271_v34 }
 0x604   :  { %262 = vrot.lane.b32.xlu1 %v710_v30, %s782_s9 }
 0x605   :  { %v274_v36 = vadd.f32 %v835_v10, %v273_v35 }
 0x676   :  { %v263_v31 = vpop.permute.xlu1 %262 }
 0x677   :  { %v265_v32 = vmul.f32 %v263_v31, %v246_v24 }
 0x679   :  { %276 = vrot.lane.b32.xlu2 %v265_v32, %s783_s2 }
 0x6d3   :  { %v277_v33 = vpop.permute.xlu2 %276 }
 0x6d4   :  { %659 = vmatmul.msk.f32.vlgmr.msra.gmra.mxu3 %vm60_vm4, %v277_v33 }
 0x757   :  { %v297_v37 = vpop.f32.mrf.mxu3 }
 0x758   :  { %v300_v38 = vadd.f32 %v297_v37, %v274_v36 }
 0x75a   :  { %711 = vtanh.f32 %v300_v38  ;;  %v660_v40 = vmul.f32 -1.442695, %v300_v38 }
 0x75c   :  { %713 = vpow2.f32 %v660_v40 }
 0x760   :  { %v712_v39 = vpop.eup %711 }
 0x761   :  { %323 = vrot.lane.b32.xlu1 %v712_v39, %s782_s9 }
 0x762   :  { %v714_v41 = vpop.eup %713 }
 0x763   :  { %v304_v42 = vadd.f32 1.0, %v714_v41 }
 0x765   :  { %715 = vrcp.f32 %v304_v42  ;;  %v316_v48 = vand.u32 2147483648, %v304_v42  ;;  %vm310_vm14 = vweird.f32 %v304_v42  ;;  %v314_v49 = vand.u32 2147483647, %v304_v42 }
 0x767   :  { %v317_v51 = vor.u32 1.1754944e-38, %v316_v48  ;;  %vm315_vm0 = vcmp.eq.f32.partialorder %v314_v49, 8.507059e+37 }
 0x76b   :  { %v716_v43 = vpop.eup %715 }
 0x76c   :  { %v306_v44 = vmul.f32 %v716_v43, %v304_v42  ;;  %vm311_vm13 = vweird.f32 %v716_v43 }
 0x76d   :  { %vm312_vm15 = vmor %vm310_vm14, %vm311_vm13 }
 0x76e   :  { %v307_v45 = vsub.f32 1.0, %v306_v44 }
 0x770   :  { %v308_v46 = vmul.f32 %v716_v43, %v307_v45 }
 0x772   :  { %v309_v47 = vadd.f32 %v716_v43, %v308_v46 }
 0x774   :  { %v313_v50 = vsel %vm312_vm15, %v716_v43, %v309_v47 }
 0x775   :  { %v318_v53 = vsel %vm315_vm0, %v317_v51, %v313_v50  ;;  %v667_v51 = vld [vmem:[%s921_s0 + $0xc] sm:$0x3] }
 0x776   :  { %v321_v56 = vmul.f32 %v318_v53, %v259_v29 }
 0x7d3   :  { %v324_v52 = vpop.permute.xlu1 %323 }
 0x7d4   :  { %v326_v54 = vmul.f32 %v324_v52, %v318_v53 }
 0x7d6   :  { %328 = vrot.lane.b32.xlu2 %v326_v54, %s783_s2 }
 0x7de   :  { %342 = vperm.xlu2 %682, %v661_v55  }
 0x830   :  { %v329_v57 = vpop.permute.xlu2 %328 }
 0x831   :  { %v331_v58 = vadd.f32 %v329_v57, %v321_v56 }
 0x833   :  { %717 = vtanh.f32 %v331_v58 }
 0x838   :  { %v343_v63 = vpop.permute.xlu2 %342 }
 0x839   :  { %v718_v59 = vpop.eup %717  ;;  %v345_v0 = vmul.f32 %v829_v7, %v343_v63 }
 0x83a   :  { %334 = vrot.lane.b32.xlu0 %v718_v59, %s782_s9 }
 0x83b   :  { %v346_v1 = vadd.f32 %v835_v10, %v345_v0 }
 0x8ac   :  { %v335_v60 = vpop.permute.xlu0 %334 }
 0x8ad   :  { %v337_v61 = vmul.f32 %v335_v60, %v318_v53 }
 0x8af   :  { %348 = vrot.lane.b32.xlu1 %v337_v61, %s783_s2 }
 0x921   :  { %v349_v62 = vpop.permute.xlu1 %348 }
 0x922   :  { %662 = vmatmul.msk.f32.vlgmr.msrb.gmra.mxu0 %vm60_vm4, %v349_v62 }
 0x99f   :  { %v369_v2 = vpop.f32.mrf.mxu0 }
 0x9a0   :  { %v372_v3 = vadd.f32 %v369_v2, %v346_v1 }
 0x9a2   :  { %719 = vtanh.f32 %v372_v3  ;;  %v663_v5 = vmul.f32 -1.442695, %v372_v3 }
 0x9a4   :  { %721 = vpow2.f32 %v663_v5 }
 0x9a8   :  { %v720_v4 = vpop.eup %719 }
 0x9a9   :  { %395 = vrot.lane.b32.xlu0 %v720_v4, %s782_s9 }
 0x9aa   :  { %v722_v6 = vpop.eup %721 }
 0x9ab   :  { %v376_v8 = vadd.f32 1.0, %v722_v6 }
 0x9ad   :  { %723 = vrcp.f32 %v376_v8  ;;  %v388_v15 = vand.u32 2147483648, %v376_v8  ;;  %vm382_vm2 = vweird.f32 %v376_v8  ;;  %v386_v16 = vand.u32 2147483647, %v376_v8 }
 0x9af   :  { %v389_v18 = vor.u32 1.1754944e-38, %v388_v15  ;;  %vm387_vm5 = vcmp.eq.f32.partialorder %v386_v16, 8.507059e+37 }
 0x9b3   :  { %v724_v9 = vpop.eup %723 }
 0x9b4   :  { %v378_v11 = vmul.f32 %v724_v9, %v376_v8  ;;  %vm383_vm1 = vweird.f32 %v724_v9 }
 0x9b5   :  { %vm384_vm3 = vmor %vm382_vm2, %vm383_vm1  ;;  %vm637_vm1 = vcmask 254976   ;;  %vm644_vm2 = vcmask 1024  }
 0x9b6   :  { %v379_v12 = vsub.f32 1.0, %v378_v11 }
 0x9b8   :  { %v380_v13 = vmul.f32 %v724_v9, %v379_v12 }
 0x9ba   :  { %v381_v14 = vadd.f32 %v724_v9, %v380_v13 }
 0x9bc   :  { %v385_v17 = vsel %vm384_vm3, %v724_v9, %v381_v14 }
 0x9bd   :  { %v390_v20 = vsel %vm387_vm5, %v389_v18, %v385_v17  ;;  %v670_v18 = vld [vmem:[%s921_s0 + $0xe] sm:$0x3] }
 0x9be   :  { %v393_v23 = vmul.f32 %v390_v20, %v331_v58 }
 0xa1b   :  { %v396_v19 = vpop.permute.xlu0 %395 }
 0xa1c   :  { %v398_v21 = vmul.f32 %v396_v19, %v390_v20 }
 0xa1e   :  { %400 = vrot.lane.b32.xlu1 %v398_v21, %s783_s2 }
 0xa26   :  { %414 = vperm.xlu1 %683, %v664_v22  }
 0xa90   :  { %v401_v24 = vpop.permute.xlu1 %400 }
 0xa91   :  { %v403_v25 = vadd.f32 %v401_v24, %v393_v23 }
 0xa93   :  { %725 = vtanh.f32 %v403_v25 }
 0xa98   :  { %v415_v30 = vpop.permute.xlu1 %414 }
 0xa99   :  { %v726_v26 = vpop.eup %725  ;;  %v417_v31 = vmul.f32 %v829_v7, %v415_v30 }
 0xa9a   :  { %406 = vrot.lane.b32.xlu2 %v726_v26, %s782_s9 }
 0xa9b   :  { %v418_v32 = vadd.f32 %v835_v10, %v417_v31 }
 0xaf4   :  { %v407_v27 = vpop.permute.xlu2 %406 }
 0xaf5   :  { %v409_v28 = vmul.f32 %v407_v27, %v390_v20 }
 0xaf7   :  { %420 = vrot.lane.b32.xlu0 %v409_v28, %s783_s2 }
 0xb69   :  { %v421_v29 = vpop.permute.xlu0 %420 }
 0xb6a   :  { %665 = vmatmul.msk.f32.vlgmr.msrb.gmra.mxu1 %vm60_vm4, %v421_v29 }
 0xbe7   :  { %v441_v33 = vpop.f32.mrf.mxu1 }
 0xbe8   :  { %v444_v34 = vadd.f32 %v441_v33, %v418_v32 }
 0xbea   :  { %727 = vtanh.f32 %v444_v34  ;;  %v666_v36 = vmul.f32 -1.442695, %v444_v34 }
 0xbec   :  { %729 = vpow2.f32 %v666_v36 }
 0xbf0   :  { %v728_v35 = vpop.eup %727 }
 0xbf1   :  { %467 = vrot.lane.b32.xlu2 %v728_v35, %s782_s9  ;;  %v686_v35 = vld [vmem:[%s925_s4] ss:$0 sm:$0xff] }
 0xbf2   :  { %v730_v37 = vpop.eup %729 }
 0xbf3   :  { %v448_v38 = vadd.f32 1.0, %v730_v37 }
 0xbf5   :  { %731 = vrcp.f32 %v448_v38  ;;  %v460_v44 = vand.u32 2147483648, %v448_v38  ;;  %vm454_vm7 = vweird.f32 %v448_v38  ;;  %v458_v45 = vand.u32 2147483647, %v448_v38 }
 0xbf7   :  { %v461_v47 = vor.u32 1.1754944e-38, %v460_v44  ;;  %vm459_vm9 = vcmp.eq.f32.partialorder %v458_v45, 8.507059e+37 }
 0xbfb   :  { %v732_v39 = vpop.eup %731 }
 0xbfc   :  { %v450_v40 = vmul.f32 %v732_v39, %v448_v38  ;;  %vm455_vm6 = vweird.f32 %v732_v39 }
 0xbfd   :  { %vm456_vm8 = vmor %vm454_vm7, %vm455_vm6 }
 0xbfe   :  { %v451_v41 = vsub.f32 1.0, %v450_v40 }
 0xc00   :  { %v452_v42 = vmul.f32 %v732_v39, %v451_v41 }
 0xc02   :  { %v453_v43 = vadd.f32 %v732_v39, %v452_v42 }
 0xc04   :  { %v457_v46 = vsel %vm456_vm8, %v732_v39, %v453_v43 }
 0xc05   :  { %v462_v49 = vsel %vm459_vm9, %v461_v47, %v457_v46 }
 0xc06   :  { %v465_v52 = vmul.f32 %v462_v49, %v403_v25 }
 0xc4b   :  { %v468_v48 = vpop.permute.xlu2 %467 }
 0xc4c   :  { %v470_v50 = vmul.f32 %v468_v48, %v462_v49 }
 0xc4e   :  { %472 = vrot.lane.b32.xlu0 %v470_v50, %s783_s2 }
 0xc56   :  { %486 = vperm.xlu0 %681, %v667_v51  }
 0xcc0   :  { %v473_v53 = vpop.permute.xlu0 %472 }
 0xcc1   :  { %v475_v54 = vadd.f32 %v473_v53, %v465_v52 }
 0xcc3   :  { %733 = vtanh.f32 %v475_v54 }
 0xcc8   :  { %v487_v59 = vpop.permute.xlu0 %486 }
 0xcc9   :  { %v734_v55 = vpop.eup %733  ;;  %v489_v60 = vmul.f32 %v829_v7, %v487_v59 }
 0xcca   :  { %478 = vrot.lane.b32.xlu1 %v734_v55, %s782_s9 }
 0xccb   :  { %v490_v61 = vadd.f32 %v835_v10, %v489_v60 }
 0xd3c   :  { %v479_v56 = vpop.permute.xlu1 %478 }
 0xd3d   :  { %v481_v57 = vmul.f32 %v479_v56, %v462_v49  ;;  %v642_v56 = vstv %s926_s5 }
 0xd3f   :  { %492 = vrot.lane.b32.xlu2 %v481_v57, %s783_s2 }
 0xd99   :  { %v493_v58 = vpop.permute.xlu2 %492 }
 0xd9a   :  { %668 = vmatmul.msk.f32.vlgmr.msrb.gmra.mxu2 %vm60_vm4, %v493_v58 }
 0xe1d   :  { %v513_v62 = vpop.f32.mrf.mxu2 }
 0xe1e   :  { %v516_v63 = vadd.f32 %v513_v62, %v490_v61 }
 0xe20   :  { %735 = vtanh.f32 %v516_v63  ;;  %v669_v1 = vmul.f32 -1.442695, %v516_v63 }
 0xe22   :  { %737 = vpow2.f32 %v669_v1 }
 0xe26   :  { %v736_v0 = vpop.eup %735 }
 0xe27   :  { %539 = vrot.lane.b32.xlu1 %v736_v0, %s782_s9 }
 0xe28   :  { %v738_v2 = vpop.eup %737 }
 0xe29   :  { %v520_v3 = vadd.f32 1.0, %v738_v2 }
 0xe2b   :  { %739 = vrcp.f32 %v520_v3  ;;  %v532_v11 = vand.u32 2147483648, %v520_v3  ;;  %vm526_vm11 = vweird.f32 %v520_v3  ;;  %v530_v12 = vand.u32 2147483647, %v520_v3 }
 0xe2d   :  { %v533_v14 = vor.u32 1.1754944e-38, %v532_v11  ;;  %vm531_vm13 = vcmp.eq.f32.partialorder %v530_v12, 8.507059e+37 }
 0xe31   :  { %v740_v4 = vpop.eup %739 }
 0xe32   :  { %v522_v5 = vmul.f32 %v740_v4, %v520_v3  ;;  %vm527_vm10 = vweird.f32 %v740_v4 }
 0xe33   :  { %vm528_vm12 = vmor %vm526_vm11, %vm527_vm10 }
 0xe34   :  { %v523_v6 = vsub.f32 1.0, %v522_v5 }
 0xe36   :  { %v524_v8 = vmul.f32 %v740_v4, %v523_v6 }
 0xe38   :  { %v525_v9 = vadd.f32 %v740_v4, %v524_v8 }
 0xe3a   :  { %v529_v13 = vsel %vm528_vm12, %v740_v4, %v525_v9 }
 0xe3b   :  { %v534_v16 = vsel %vm531_vm13, %v533_v14, %v529_v13 }
 0xe3c   :  { %v537_v19 = vmul.f32 %v534_v16, %v475_v54 }
 0xe99   :  { %v540_v15 = vpop.permute.xlu1 %539 }
 0xe9a   :  { %v542_v17 = vmul.f32 %v540_v15, %v534_v16 }
 0xe9c   :  { %544 = vrot.lane.b32.xlu2 %v542_v17, %s783_s2 }
 0xea4   :  { %558 = vperm.xlu2 %682, %v670_v18  }
 0xef6   :  { %v545_v20 = vpop.permute.xlu2 %544 }
 0xef7   :  { %v547_v21 = vadd.f32 %v545_v20, %v537_v19 }
 0xef9   :  { %741 = vtanh.f32 %v547_v21 }
 0xefe   :  { %v559_v26 = vpop.permute.xlu2 %558 }
 0xeff   :  { %v742_v22 = vpop.eup %741  ;;  %v561_v27 = vmul.f32 %v829_v7, %v559_v26 }
 0xf00   :  { %550 = vrot.lane.b32.xlu0 %v742_v22, %s782_s9 }
 0xf01   :  { %v562_v28 = vadd.f32 %v835_v10, %v561_v27 }
 0xf72   :  { %v551_v23 = vpop.permute.xlu0 %550 }
 0xf73   :  { %v553_v24 = vmul.f32 %v551_v23, %v534_v16 }
 0xf75   :  { %564 = vrot.lane.b32.xlu1 %v553_v24, %s783_s2 }
 0xfe7   :  { %v565_v25 = vpop.permute.xlu1 %564 }
 0xfe8   :  { %671 = vmatmul.msk.f32.vlgmr.msrb.gmra.mxu3 %vm60_vm4, %v565_v25 }
0x106b   :  { %v585_v29 = vpop.f32.mrf.mxu3 }
0x106c   :  { %v588_v30 = vadd.f32 %v585_v29, %v562_v28 }
0x106e   :  { %743 = vtanh.f32 %v588_v30  ;;  %v672_v32 = vmul.f32 -1.442695, %v588_v30 }
0x1070   :  { %745 = vpow2.f32 %v672_v32 }
0x1074   :  { %v744_v31 = vpop.eup %743 }
0x1075   :  { %611 = vrot.lane.b32.xlu0 %v744_v31, %s782_s9 }
0x1076   :  { %v746_v33 = vpop.eup %745 }
0x1077   :  { %v592_v34 = vadd.f32 1.0, %v746_v33 }
0x1079   :  { %747 = vrcp.f32 %v592_v34  ;;  %v604_v39 = vand.u32 2147483648, %v592_v34  ;;  %vm598_vm14 = vweird.f32 %v592_v34  ;;  %v602_v40 = vand.u32 2147483647, %v592_v34 }
0x107b   :  { %v605_v42 = vor.u32 1.1754944e-38, %v604_v39  ;;  %vm603_vm0 = vcmp.eq.f32.partialorder %v602_v40, 8.507059e+37 }
0x107d   :  { %629 = vrot.lane.b32.xlu0 %v686_v35, %s784_s24 }
0x107f   :  { %v748_v7 = vpop.eup %747 }
0x1080   :  { %v594_v36 = vmul.f32 %v748_v7, %v592_v34  ;;  %vm599_vm4 = vweird.f32 %v748_v7 }
0x1081   :  { %vm600_vm15 = vmor %vm598_vm14, %vm599_vm4 }
0x1082   :  { %v595_v10 = vsub.f32 1.0, %v594_v36 }
0x1084   :  { %v596_v37 = vmul.f32 %v748_v7, %v595_v10 }
0x1086   :  { %v597_v38 = vadd.f32 %v748_v7, %v596_v37 }
0x1088   :  { %v601_v41 = vsel %vm600_vm15, %v748_v7, %v597_v38 }
0x1089   :  { %v606_v44 = vsel %vm603_vm0, %v605_v42, %v601_v41 }
0x108a   :  { %v609_v46 = vmul.f32 %v606_v44, %v547_v21 }
0x10e7   :  { %v612_v43 = vpop.permute.xlu0 %611 }
0x10e8   :  { %v614_v45 = vmul.f32 %v612_v43, %v606_v44 }
0x10ea   :  { %616 = vrot.lane.b32.xlu1 %v614_v45, %s783_s2 }
0x10ef   :  { %v630_v51 = vpop.permute.xlu0 %629 }
0x115c   :  { %v617_v47 = vpop.permute.xlu1 %616 }
0x115d   :  { %v619_v48 = vadd.f32 %v617_v47, %v609_v46 }
0x115f   :  { %749 = vtanh.f32 %v619_v48 }
0x1165   :  { %v750_v49 = vpop.eup %749 }
0x1166   :  { %622 = vrot.lane.b32.xlu2 %v750_v49, %s782_s9 }
0x11c0   :  { %v623_v50 = vpop.permute.xlu2 %622 }
0x11c1   :  { %v625_v52 = vmul.f32 %v623_v50, %v606_v44 }
0x11c3   :  { %v632_v53 = vmul.f32 %v630_v51, %v625_v52 }
0x11c5   :  { %634 = vrot.lane.b32.xlu1 %v632_v53, %s783_s2 }
0x1237   :  { %v635_v54 = vpop.permute.xlu1 %634 }
0x1238   :  { %v638_v55 = vsel %vm637_vm1, %v635_v54, 0.0 }
0x1239   :  { %639 = vadd.xlane.f32.xlu2 %v638_v55 }
0x12ac   :  { %v640_v57 = vpop.xlane.xlu2 %639 }
0x12ad   :  { %v643_v58 = vadd.f32 %v642_v56, %v640_v57 }
0x12af   :  { %645 = vst.msk [vmem:[%s927_s6] sm:$0x3] %vm644_vm2, %v643_v58 }
0x12b0   :  { %650 = vsyncpa [#allocation4], 1 }

</bundles_post_ra>
